<compile_context>
chip_gen: v6e
topology: v6e:2x2x1
jax: 0.10.0
libtpu: 0.0.40
codegen_flags: <defaults>
</compile_context>

<pallas_src>
import jax
import jax.numpy as jnp
from jax.experimental import pallas as pl
from jax.experimental.pallas import tpu as pltpu


def _add_inverse_kernel(x_ref, o_ref):
    # x_ref: (TC, TH) VMEM tile of the flattened input
    # o_ref: (2, TC, TH) VMEM tile of the flattened output
    x = x_ref[...]
    o_ref[0] = x        # identity half
    o_ref[1] = 1 - x    # weak-typed 1 keeps x's dtype (bf16 stays bf16)


_TARGET_TILE_BYTES = 2 * 1024 * 1024  # ~2 MiB input tile


def _pick_tiles(C, HW, itemsize):
    """Choose (channel_tile, lane_tile) keeping the (8, 128) rules satisfied."""
    # Lane tile over flattened H*W: full extent if small / not 128-aligned,
    # otherwise a large multiple of 128.
    if HW % 128 != 0 or HW * itemsize <= _TARGET_TILE_BYTES:
        th = HW
    else:
        th = min(HW, max(128, (_TARGET_TILE_BYTES // itemsize) // 128 * 128))
    # Channel (sublane) tile: full extent or a multiple of 8.
    rows = max(1, _TARGET_TILE_BYTES // (th * itemsize))
    if rows >= C:
        tc = C
    else:
        tc = min(C, max(8, (rows // 8) * 8))
    return tc, th


def add_inverse(x):
    """Concatenate [x, 1 - x] along the channel axis (dim=1), NCHW layout."""
    B, C, H, W = x.shape
    HW = H * W
    itemsize = jnp.dtype(x.dtype).itemsize

    tc, th = _pick_tiles(C, HW, itemsize)
    grid = (B, pl.cdiv(C, tc), pl.cdiv(HW, th))

    x_flat = x.reshape(B, C, HW)  # lane-dense last dim (free reshape)

    out_flat = pl.pallas_call(
        _add_inverse_kernel,
        out_shape=jax.ShapeDtypeStruct((B, 2, C, HW), x.dtype),
        grid_spec=pl.GridSpec(
            grid=grid,
            in_specs=[
                # Batch dim squeezed out of the kernel view.
                pl.BlockSpec((None, tc, th), lambda b, c, h: (b, c, h)),
            ],
            out_specs=pl.BlockSpec(
                (None, 2, tc, th), lambda b, c, h: (b, 0, c, h)
            ),
        ),
        compiler_params=pltpu.CompilerParams(
            dimension_semantics=("parallel", "parallel", "parallel"),
            vmem_limit_bytes=32 * 1024 * 1024,
        ),
    )(x_flat)

    # (B, 2, C, H*W) -> (B, 2C, H, W): identical memory order as torch.cat
    # along dim=1, so this reshape is layout-free.
    return out_flat.reshape(B, 2 * C, H, W)


if __name__ == "__main__":
    key = jax.random.PRNGKey(0)
    x = jax.random.uniform(key, (2, 4, 16, 16), dtype=jnp.float32)

    out = jax.block_until_ready(add_inverse(x))

    # Reference check (plain JAX)
    ref = jnp.concatenate([x, 1 - x], axis=1)
    assert out.shape == (2, 8, 16, 16), out.shape
    assert out.dtype == x.dtype, out.dtype
    assert jnp.allclose(out, ref), "mismatch vs reference"

    print("KERNEL_OK")
</pallas_src>

<mosaic_0001>
module attributes {stable_mosaic.version = 11 : i64} {
  func.func @_add_inverse_kernel(%arg0: i32, %arg1: i32, %arg2: i32, %arg3: memref<1x4x256xf32, #tpu.memory_space<vmem>>, %arg4: memref<1x2x4x256xf32, #tpu.memory_space<vmem>>) attributes {dimension_semantics = [#tpu.dimension_semantics<parallel>, #tpu.dimension_semantics<parallel>, #tpu.dimension_semantics<parallel>], iteration_bounds = array<i64: 2, 1, 1>, scalar_prefetch = 0 : i64, scratch_operands = 0 : i64, tpu.core_type = #tpu.core_type<tc>, window_params = [{transform_indices = @transform_0, window_bounds = array<i64: 1, 4, 256>}, {transform_indices = @transform_1, window_bounds = array<i64: 1, 2, 4, 256>}]} {
    %c0 = arith.constant 0 : index
    %c0_0 = arith.constant 0 : index
    %c0_1 = arith.constant 0 : index
    %0 = vector.load %arg3[%c0, %c0_0, %c0_1] : memref<1x4x256xf32, #tpu.memory_space<vmem>>, vector<1x4x256xf32>
    %1 = vector.shape_cast %0 : vector<1x4x256xf32> to vector<4x256xf32>
    %c0_2 = arith.constant 0 : index
    %c0_3 = arith.constant 0 : index
    %c0_4 = arith.constant 0 : index
    %c0_5 = arith.constant 0 : index
    %2 = vector.load %arg4[%c0_2, %c0_3, %c0_4, %c0_5] : memref<1x2x4x256xf32, #tpu.memory_space<vmem>>, vector<1x1x4x256xf32>
    %3 = vector.shape_cast %2 : vector<1x1x4x256xf32> to vector<4x256xf32>
    %4 = vector.shape_cast %1 : vector<4x256xf32> to vector<1x1x4x256xf32>
    tpu.vector_store %arg4[%c0_2, %c0_3, %c0_4, %c0_5], %4 {strides = array<i32>} : memref<1x2x4x256xf32, #tpu.memory_space<vmem>>, vector<1x1x4x256xf32>,
    %cst = arith.constant 1.000000e+00 : f32
    %5 = vector.broadcast %cst : f32 to vector<4x256xf32>
    %6 = arith.subf %5, %1 : vector<4x256xf32>
    %c0_6 = arith.constant 0 : index
    %c1 = arith.constant 1 : index
    %c0_7 = arith.constant 0 : index
    %c0_8 = arith.constant 0 : index
    %7 = vector.load %arg4[%c0_6, %c1, %c0_7, %c0_8] : memref<1x2x4x256xf32, #tpu.memory_space<vmem>>, vector<1x1x4x256xf32>
    %8 = vector.shape_cast %7 : vector<1x1x4x256xf32> to vector<4x256xf32>
    %9 = vector.shape_cast %6 : vector<4x256xf32> to vector<1x1x4x256xf32>
    tpu.vector_store %arg4[%c0_6, %c1, %c0_7, %c0_8], %9 {strides = array<i32>} : memref<1x2x4x256xf32, #tpu.memory_space<vmem>>, vector<1x1x4x256xf32>,
    return
  }
  func.func @transform_0(%arg0: i32, %arg1: i32, %arg2: i32) -> (i32, i32, i32) {
    %c0_i32 = arith.constant 0 : i32
    return %arg0, %arg1, %arg2 : i32, i32, i32
  }
  func.func @transform_1(%arg0: i32, %arg1: i32, %arg2: i32) -> (i32, i32, i32, i32) {
    %c0_i32 = arith.constant 0 : i32
    %c0_i32_0 = arith.constant 0 : i32
    return %arg0, %c0_i32, %arg1, %arg2 : i32, i32, i32, i32
  }
}

</mosaic_0001>

<bundles_post_ra>
// kernel: tpu_custom_call.1
= control target key start
LH: loop header
LB: loop body
LE: loop exit
PB: predicated region body
PF: predicated region fallthrough
CT: control target
= control target key end

     0   :  { %6 = vsyncpa [#allocation3], 0  ;;  %s638_s0 = inlined_call_operand.hbm [shape: f32[2,4,256], index: 0, kind: input, shape index: {}]   ;;  %s639_s1 = inlined_call_operand.hbm [shape: f32[2,2,4,256], index: 1, kind: output, shape index: {}]  }
   0x1   :  { %8 = vsyncpa [#allocation3 + $0x1], 0 }
   0x2   :  { %9 = vsyncpa [#allocation4], 0 }
   0x3   :  { %11 = vsyncpa [#allocation4 + $0x1], 0  ;;  %s489_s6 = smov 0   ;;  %s491_s7 = smov 0  }
   0x4   :  { %s493_s8 = smov 0   ;;  %s495_s9 = smov 0  }
   0x5   :  { %s497_s10 = smov 0   ;;  %s499_s11 = smov 0  }
   0x6 LB: > { %s283_s12 = sadd.s32 4294967295, %s473_s11   ;;  %s284_s13 = sadd.s32 4294967294, %s473_s11   ;;  %s473_s11 = sphi %s499_s11, %s17_s11   ;;  %s469_s10 = sphi %s497_s10, %s651_s10   ;;  %s465_s9 = sphi %s495_s9, %s650_s9   ;;  %s461_s8 = sphi %s493_s8, %s649_s8   ;;  %s457_s7 = sphi %s491_s7, %s648_s7   ;;  %s453_s6 = sphi %s489_s6, %s647_s6  }
   0x7   : > { %s36_s14 = sadd.s32 1, %s469_s10  ;;  %s47_s15 = sadd.s32 1, %s461_s8 }
   0x8   : > { %p38_p0 = scmp.ge.s32.totalorder %s36_s14, 2  ;;  %p54_p1 = scmp.ne.s32.totalorder %s461_s8, %s457_s7 }
   0x9   : > { %p55_p2 = scmp.eq.s32.totalorder %s473_s11, 0  ;;  %p60_p3 = scmp.ne.s32.totalorder %s457_s7, %s453_s6 }
   0xa   : > { %s653_s14 = smov (%p38_p0, %s36_s14), 0  ;;  %p61_p5 = scmp.eq.s32.totalorder %s283_s12, 0 }
   0xb   : > { %p530_p4 = por %p55_p2, %p54_p1  ;;  %s40_s17 = ssub.s32 %s469_s10, %s653_s14 }
   0xc   : > { %p88_p6 = scmp.eq.s32.totalorder %s283_s12, 1  ;;  %p45_p7 = scmp.eq.s32.totalorder %s40_s17, 0 }
   0xd   : > { %p536_p8 = por %p61_p5, %p60_p3  ;;  %p94_p10 = scmp.eq.s32.totalorder %s284_s13, 1 }
   0xe   : > { %p540_p9 = por %p88_p6, %p54_p1  ;;  %p313_p13 = scmp.lt.s32.totalorder %s473_s11, 2 }
   0xf   : > { %s545_s20 = scalar_select %p45_p7, %s461_s8, %s47_s15  }
  0x10   : > { %p547_p11 = por %p94_p10, %p60_p3  ;;  %s114_s22 = sand.u32 1, %s461_s8  }
  0x11   : > { %s287_s23 = sshll.u32 %s114_s22, 3  ;;  %s299_s24 = sshll.u32 %s469_s10, 7 }
  0x12   : > { %s643_s21 = scalar_select %p547_p11, 1, 0 }
  0x13   : > { %s128_s27 = scalar_lea.hbm %s638_s0, %s299_s24  ;;  %s118_s28 = scalar_lea.vmem [#allocation2], %s287_s23 }
  0x14   : > { %s130_s29 = sshll.u32 %s118_s28, 4  ;;  %p560_p0 = pnand %p313_p13, %p530_p4  ;;  %s131_s29 = int_to_ptr.vmem [resolvable:$true] %s130_s29 }
  0x15   : > { %p290_p1 = scmp.ge.s32.totalorder %s473_s11, 1  ;;  %p135_p2 = scmp.lt.s32.totalorder %s473_s11, 3 }
  0x16   : > { %s115_s2 = scalar_lea.sflag [#allocation3], %s114_s22  ;;  %p367_p3 = pneg %p560_p0 }
  0x17   : > { %s378_s3 = scalar_lea.vmem %s131_s29, 128  ;;  %s475_s4 = smov [#allocation2]  }
  0x18   : > { %p379_p5 = scmp.ne.s32.totalorder %s131_s29, %s378_s3  ;;  %s383_s5 = sshll.u32 %s475_s4, 4  ;;  %s384_s5 = int_to_ptr.vmem [resolvable:$false] %s383_s5 }
  0x19   : > { %s385_s12 = scalar_lea.vmem %s384_s5, 256  ;;  %p386_p10 = scmp.lt.s32.totalorder %s131_s29, %s384_s5 }
  0x1a   : > { %p381_p6 = pnand %p379_p5, %p367_p3  ;;  %p387_p12 = scmp.lt.s32.totalorder %s385_s12, %s378_s3 }
  0x1c   : > { %p382_p7 = pneg %p381_p6  ;;  %p388_p4 = por %p387_p12, %p386_p10 }
  0x1e   : > { %p389_p13 = pnand %p388_p4, %p382_p7 }
  0x20   : > { %392 = shalt.err (!%p389_p13)
}
  0x21   : > { %308 = dma.hbm_to_vmem [thread:$0]  (!%p560_p0), %s128_s27, 128, %s131_s29, %s115_s2  }
  0x22   : > { %p136_p11 = pnand %p290_p1, %p135_p2 }
  0x23   : > { %s575_s13 = sand.u32 (!%p136_p11), 1, %s457_s7  }
  0x24   : > { %139 = sbr.rel (%p136_p11) target bundleno = 67 (0x43), region = 24  ;;  %s291_s15 = sshll.u32 (!%p136_p11), %s575_s13, 3 }
  0x25   : > { %s142_s16 = scalar_lea.sflag (!%p136_p11), [#allocation3], %s575_s13  ;;  %s145_s17 = scalar_lea.vmem (!%p136_p11), [#allocation2], %s291_s15 }
  0x29   : > { %444 = dma.done.wait (%p536_p8), %s142_s16, 128  }
  0x2a   : > { %446 = vsyncadd (%p536_p8), %s142_s16, 4294967168  ;;  %s292_s22 = sshll.u32 %s575_s13, 4  ;;  %s300_s25 = sshll.u32 %s465_s9, 8  ;;  %v166_v0 = vld [vmem:[%s145_s17] sm:$0xff] }
  0x2b   : > { %s163_s23 = scalar_lea.vmem [#allocation5], %s292_s22  ;;  %s590_s28 = scalar_lea.hbm %s639_s1, %s300_s25  ;;  %v168_v1 = vsub.f32 1.0, %v166_v0 }
  0x2c   : > { %s189_s24 = sshll.u32 %s163_s23, 4  ;;  %167 = vst [vmem:[%s163_s23] sm:$0xff] %v166_v0  ;;  %s172_s18 = scalar_lea.sflag [#allocation4], %s575_s13  ;;  %s585_s24 = int_to_ptr.vmem [resolvable:$true] %s189_s24 }
  0x2d   : > { %293 = vst [vmem:[%s163_s23 + $0x8] sm:$0xff] %v168_v1  ;;  %s393_s29 = scalar_lea.vmem %s585_s24, 256  ;;  %s476_s9 = smov [#allocation5]  }
  0x2e   : > { %p394_p8 = scmp.ne.s32.totalorder %s585_s24, %s393_s29  ;;  %s397_s30 = sshll.u32 %s476_s9, 4  ;;  %s398_s30 = int_to_ptr.vmem [resolvable:$false] %s397_s30 }
  0x2f   : > { %s399_s2 = scalar_lea.vmem %s398_s30, 512  ;;  %p400_p0 = scmp.lt.s32.totalorder %s585_s24, %s398_s30 }
  0x30   : > { %p395_p11 = pnand %p394_p8, %p540_p9  ;;  %p401_p1 = scmp.lt.s32.totalorder %s399_s2, %s393_s29 }
  0x32   : > { %p396_p12 = pneg %p395_p11  ;;  %p402_p2 = por %p401_p1, %p400_p0 }
  0x34   : > { %p403_p3 = pnand %p402_p2, %p396_p12 }
  0x36   : > { %406 = shalt.err (!%p403_p3)
}
  0x37   : > { %s407_s3 = scalar_lea.hbm %s590_s28, 256  ;;  %s411_s12 = scalar_lea.hbm %s639_s1, 512 }
  0x38   : > { %p408_p5 = scmp.ne.s32.totalorder %s590_s28, %s407_s3  ;;  %p412_p10 = scmp.lt.s32.totalorder %s590_s28, %s639_s1 }
  0x39   : > { %p413_p4 = scmp.lt.s32.totalorder %s411_s12, %s407_s3 }
  0x3a   : > { %p409_p6 = pnand %p408_p5, %p540_p9 }
  0x3b   : > { %p414_p13 = por %p413_p4, %p412_p10 }
  0x3c   : > { %p410_p7 = pneg %p409_p6 }
  0x3e   : > { %p415_p8 = pnand %p414_p13, %p410_p7 }
  0x40   : > { %418 = shalt.err (!%p415_p8)
}
  0x41   : > { %s477_s17 = smov 128   ;;  %s478_s22 = smov 8  }
  0x42   : > { %303 = dma.vmem_to_hbm [thread:$0]  (%p540_p9), %s585_s24, 256, %s590_s28, %s172_s18, %s477_s17, %s477_s17, %s478_s22  }
  0x43 PF: > { %s204_s23 = sand.u32 1, %s453_s6   ;;  %p645_p11 = scmp.ne.s32.totalorder %s643_s21, 0 }
  0x44   : > { %p646_p12 = scmp.ge.s32.totalorder %s473_s11, 2  ;;  %s205_s25 = scalar_lea.sflag [#allocation4], %s204_s23 }
  0x46   : > { %p310_p0 = pnand %p646_p12, %p645_p11 }
  0x48   : > { %p311_p1 = pneg %p310_p0 }
  0x4a   : > { %448 = dma.done.wait (%p311_p1), %s205_s25, 256  }
  0x4b   : > { %450 = vsyncadd (%p311_p1), %s205_s25, 4294967040  ;;  %s17_s11 = sadd.s32 1, %s473_s11   ;;  %s647_s6 = smov %s457_s7 }
  0x4c   : > { %p14_p2 = scmp.ge.s32.totalorder %s17_s11, 4   ;;  %s648_s7 = smov %s461_s8 }
  0x4d   : > { %s649_s8 = smov %s545_s20  ;;  %s650_s9 = smov %s469_s10 }
  0x4e   : > { %s651_s10 = smov %s653_s14  ;;  %16 = sbr.rel (!%p14_p2) target bundleno = 6 (0x6), region = 70 }
  0x53   :  { %210 = vsyncpa [#allocation3], 1 }
  0x54   :  { %212 = vsyncpa [#allocation3 + $0x1], 1 }
  0x55   :  { %213 = vsyncpa [#allocation4], 1 }
  0x56   :  { %215 = vsyncpa [#allocation4 + $0x1], 1 }

</bundles_post_ra>
